<compile_context>
chip_gen: v7x
topology: tpu7x:2x2x1
jax: 0.10.0
libtpu: 0.0.40
codegen_flags: <defaults>
</compile_context>

<pallas_src>
import functools

import jax
import jax.numpy as jnp
from jax import lax
from jax.experimental import pallas as pl
from jax.experimental.pallas import tpu as pltpu

_LANES = 1024       # lane-dense last dim (8 vregs wide) -> long contiguous DMA bursts
_TILE_ROWS = 256    # 256 x 1024 x 4B = 1 MiB per f32 block; 4 MiB with in/out double
                    # buffering -> safe under v5e's 16 MiB / v7x's 32 MiB scoped VMEM


def _hash_u32(x):
    """lowbias32-style integer finalizer: good avalanche, pure VPU int ops."""
    x = x ^ (x >> 16)
    x = x * jnp.uint32(0x7FEB352D)
    x = x ^ (x >> 15)
    x = x * jnp.uint32(0x846CA68B)
    x = x ^ (x >> 16)
    return x


def _mc_dropout_kernel(seed_ref, x_ref, o_ref, *, signed_threshold, scale,
                       tile_rows, lanes):
    x = x_ref[...]

    # Unique global element id for this tile (counter-based RNG: masks never
    # repeat across grid steps, no per-tile reseeding needed).
    base_row = pl.program_id(0) * tile_rows
    row = lax.broadcasted_iota(jnp.int32, x.shape, 0) + base_row
    col = lax.broadcasted_iota(jnp.int32, x.shape, 1)
    gid = (row * lanes + col).astype(jnp.uint32)

    seed_u = seed_ref[0].astype(jnp.uint32)
    bits = _hash_u32(gid ^ (seed_u * jnp.uint32(0x9E3779B9)))

    # Integer-threshold compare (signed domain): drop iff bits < p * 2^32.
    bits_i32 = lax.bitcast_convert_type(bits, jnp.int32)
    keep = bits_i32 >= jnp.int32(signed_threshold)

    # Native-dtype compute: survivors scaled by 1/(1-p), dropped -> 0.
    out = jnp.where(keep, x * scale, 0.0)
    o_ref[...] = out.astype(o_ref.dtype)


def mc_dropout(x: jax.Array, *, p: float = 0.5, seed: int = 0) -> jax.Array:
    """MC-Dropout forward pass (dropout always active, training=True)."""
    if p <= 0.0:
        return x
    if p >= 1.0:
        # PyTorch returns all zeros for p == 1.
        return jnp.zeros_like(x)

    orig_shape = x.shape
    n = x.size

    # Flatten to a lane-dense 2D slab; pad so blocks are always (8,128)-legal.
    rows = pl.cdiv(n, _LANES)
    tile_rows = min(_TILE_ROWS, rows)
    tile_rows = ((tile_rows + 7) // 8) * 8
    rows_padded = pl.cdiv(rows, tile_rows) * tile_rows
    total = rows_padded * _LANES

    flat = x.reshape(-1)
    if total != n:
        flat = jnp.pad(flat, (0, total - n))
    x2d = flat.reshape(rows_padded, _LANES)

    seed_arr = jnp.asarray([seed], dtype=jnp.int32)

    # drop iff hash < p * 2^32  <=>  (hash as int32) < p * 2^32 - 2^31
    signed_threshold = int(round(p * 4294967296.0)) - 2147483648
    signed_threshold = max(-2147483648, min(signed_threshold, 2147483647))
    scale = 1.0 / (1.0 - p)

    kernel = functools.partial(
        _mc_dropout_kernel,
        signed_threshold=signed_threshold,
        scale=scale,
        tile_rows=tile_rows,
        lanes=_LANES,
    )

    grid = (rows_padded // tile_rows,)
    out2d = pl.pallas_call(
        kernel,
        out_shape=jax.ShapeDtypeStruct((rows_padded, _LANES), x.dtype),
        grid=grid,
        in_specs=[
            pl.BlockSpec(memory_space=pltpu.SMEM),                  # seed scalar
            pl.BlockSpec((tile_rows, _LANES), lambda i: (i, 0)),    # x tile
        ],
        out_specs=pl.BlockSpec((tile_rows, _LANES), lambda i: (i, 0)),
        compiler_params=pltpu.CompilerParams(
            dimension_semantics=("parallel",),  # v7x megacore: shard tiles across TCs
        ),
    )(seed_arr, x2d)

    return out2d.reshape(-1)[:n].reshape(orig_shape)


if __name__ == "__main__":
    key = jax.random.PRNGKey(0)
    # NCHW input, small shapes: batch=2, channels=4, spatial=16x16.
    x = jax.random.normal(key, (2, 4, 16, 16), dtype=jnp.float32)

    p = 0.5
    y = mc_dropout(x, p=p, seed=0)
    y = jax.block_until_ready(y)

    # Basic sanity checks on dropout semantics.
    assert y.shape == x.shape and y.dtype == x.dtype
    zero_frac = float(jnp.mean(y == 0.0))
    assert 0.3 < zero_frac < 0.7, f"unexpected drop fraction {zero_frac}"
    nonzero = y != 0.0
    # Survivors must equal x / (1 - p).
    assert bool(
        jnp.allclose(jnp.where(nonzero, y, 0.0),
                     jnp.where(nonzero, x / (1.0 - p), 0.0),
                     rtol=1e-6, atol=1e-6)
    )

    print("KERNEL_OK")
</pallas_src>

<mosaic_0001>
module attributes {stable_mosaic.version = 11 : i64} {
  func.func @_mc_dropout_kernel(%arg0: i32, %arg1: memref<1xi32, #tpu.memory_space<smem>>, %arg2: memref<8x1024xf32, #tpu.memory_space<vmem>>, %arg3: memref<8x1024xf32, #tpu.memory_space<vmem>>) attributes {dimension_semantics = [#tpu.dimension_semantics<parallel>], iteration_bounds = array<i64: 1>, scalar_prefetch = 0 : i64, scratch_operands = 0 : i64, tpu.core_type = #tpu.core_type<tc>, window_params = [{transform_indices = @transform_0, window_bounds = array<i64: 1>}, {transform_indices = @transform_1, window_bounds = array<i64: 8, 1024>}, {transform_indices = @transform_2, window_bounds = array<i64: 8, 1024>}]} {
    %c0 = arith.constant 0 : index
    %c0_0 = arith.constant 0 : index
    %0 = vector.load %arg2[%c0, %c0_0] : memref<8x1024xf32, #tpu.memory_space<vmem>>, vector<8x1024xf32>
    %c8_i32 = arith.constant 8 : i32
    %1 = arith.muli %arg0, %c8_i32 : i32
    %2 = tpu.iota {dimensions = array<i32: 0>} : vector<8x1024xi32>
    %3 = vector.broadcast %1 : i32 to vector<8x1024xi32>
    %4 = arith.addi %2, %3 : vector<8x1024xi32>
    %5 = tpu.iota {dimensions = array<i32: 1>} : vector<8x1024xi32>
    %c1024_i32 = arith.constant 1024 : i32
    %6 = vector.broadcast %c1024_i32 : i32 to vector<8x1024xi32>
    %7 = arith.muli %4, %6 : vector<8x1024xi32>
    %8 = arith.addi %7, %5 : vector<8x1024xi32>
    %c0_1 = arith.constant 0 : index
    %9 = memref.load %arg1[%c0_1] : memref<1xi32, #tpu.memory_space<smem>>
    %c-1640531527_i32 = arith.constant -1640531527 : i32
    %10 = arith.muli %9, %c-1640531527_i32 : i32
    %11 = vector.broadcast %10 : i32 to vector<8x1024xi32>
    %12 = arith.xori %8, %11 : vector<8x1024xi32>
    %c16_i32 = arith.constant 16 : i32
    %13 = vector.broadcast %c16_i32 : i32 to vector<8x1024xi32>
    %14 = arith.shrui %12, %13 : vector<8x1024xi32>
    %15 = arith.xori %12, %14 : vector<8x1024xi32>
    %c2146121005_i32 = arith.constant 2146121005 : i32
    %16 = vector.broadcast %c2146121005_i32 : i32 to vector<8x1024xi32>
    %17 = arith.muli %15, %16 : vector<8x1024xi32>
    %c15_i32 = arith.constant 15 : i32
    %18 = vector.broadcast %c15_i32 : i32 to vector<8x1024xi32>
    %19 = arith.shrui %17, %18 : vector<8x1024xi32>
    %20 = arith.xori %17, %19 : vector<8x1024xi32>
    %c-2073254261_i32 = arith.constant -2073254261 : i32
    %21 = vector.broadcast %c-2073254261_i32 : i32 to vector<8x1024xi32>
    %22 = arith.muli %20, %21 : vector<8x1024xi32>
    %c16_i32_2 = arith.constant 16 : i32
    %23 = vector.broadcast %c16_i32_2 : i32 to vector<8x1024xi32>
    %24 = arith.shrui %22, %23 : vector<8x1024xi32>
    %25 = arith.xori %22, %24 : vector<8x1024xi32>
    %26 = tpu.bitcast %25 : vector<8x1024xi32> -> vector<8x1024xi32>
    %c0_i32 = arith.constant 0 : i32
    %27 = vector.broadcast %c0_i32 : i32 to vector<8x1024xi32>
    %28 = arith.cmpi sge, %26, %27 : vector<8x1024xi32>
    %cst = arith.constant 2.000000e+00 : f32
    %29 = vector.broadcast %cst : f32 to vector<8x1024xf32>
    %30 = arith.mulf %0, %29 : vector<8x1024xf32>
    %cst_3 = arith.constant 0.000000e+00 : f32
    %31 = vector.broadcast %cst_3 : f32 to vector<8x1024xf32>
    %32 = arith.select %28, %30, %31 : vector<8x1024xi1>, vector<8x1024xf32>
    %c0_4 = arith.constant 0 : index
    %c0_5 = arith.constant 0 : index
    %33 = vector.load %arg3[%c0_4, %c0_5] : memref<8x1024xf32, #tpu.memory_space<vmem>>, vector<8x1024xf32>
    tpu.vector_store %arg3[%c0_4, %c0_5], %32 {strides = array<i32>} : memref<8x1024xf32, #tpu.memory_space<vmem>>, vector<8x1024xf32>,
    return
  }
  func.func @transform_0(%arg0: i32) -> i32 {
    %c0_i32 = arith.constant 0 : i32
    %c0_i32_0 = arith.constant 0 : i32
    return %c0_i32 : i32
  }
  func.func @transform_1(%arg0: i32) -> (i32, i32) {
    %c0_i32 = arith.constant 0 : i32
    %c0_i32_0 = arith.constant 0 : i32
    return %arg0, %c0_i32 : i32, i32
  }
  func.func @transform_2(%arg0: i32) -> (i32, i32) {
    %c0_i32 = arith.constant 0 : i32
    %c0_i32_0 = arith.constant 0 : i32
    return %arg0, %c0_i32 : i32, i32
  }
}

</mosaic_0001>

<bundles_post_ra>
// kernel: tpu_custom_call.1
= control target key start
LH: loop header
LB: loop body
LE: loop exit
PB: predicated region body
PF: predicated region fallthrough
CT: control target
= control target key end

     0   :  { %8 = vsyncpa [#allocation4], 0  ;;  %s290_s0 = inlined_call_operand.<no memory space> [shape: s32[1], index: 0, kind: input, shape index: {}]   ;;  %s291_s1 = inlined_call_operand.hbm [shape: f32[8,1024], index: 1, kind: input, shape index: {}]   ;;  %s292_s2 = inlined_call_operand.hbm [shape: f32[8,1024], index: 2, kind: output, shape index: {}]  }
   0x1   :  { %9 = vsyncpa [#allocation5], 0  ;;  %s228_s9 = smov [#allocation3]   ;;  %s180_s13 = scalar_lea.hbm %s291_s1, 1024 }
   0x2   :  { %s18_s10 = sshll.u32 %s228_s9, 4  ;;  %p181_p0 = scmp.ne.s32.totalorder %s291_s1, %s180_s13  ;;  %s19_s10 = int_to_ptr.vmem [resolvable:$true] %s18_s10 }
   0x3   :  { %p184_p1 = scmp.lt.u32.totalorder %s180_s13, %s291_s1 }
   0x5   :  { %p186_p2 = pnand %p184_p1, %p181_p0 }
   0x7   :  { %189 = shalt.err (!%p186_p2)
}
   0x8   :  { %s190_s18 = scalar_lea.vmem %s19_s10, 1024  ;;  %p195_p4 = scmp.lt.s32.totalorder %s19_s10, %s19_s10 }
   0x9   :  { %p191_p3 = scmp.ne.s32.totalorder %s19_s10, %s190_s18  ;;  %p196_p5 = scmp.lt.s32.totalorder %s190_s18, %s190_s18 }
   0xb   :  { %p197_p6 = por %p196_p5, %p195_p4 }
   0xd   :  { %p198_p7 = pnand %p197_p6, %p191_p3 }
   0xf   :  { %201 = shalt.err (!%p198_p7)
}
  0x10   :  { %21 = dma.hbm_to_vmem [thread:$0]  %s291_s1, 1024, %s19_s10, [#allocation4]  }
  0x11   :  { %224 = dma.done.wait [#allocation4], 1024  }
  0x12   :  { %225 = vsyncadd [#allocation4], 4294966272  ;;  %v34_v0 = vlaneseq  ;;  %s57_s23 = smul.u32 2654435769, %s290_s0  ;;  %v25_v16 = vld [vmem:[#allocation3] sm:$0xff]  ;;  %v26_v17 = vld [vmem:[#allocation3 + $0x8] sm:$0xff] }
  0x13   :  { %v27_v18 = vld [vmem:[#allocation3 + $0x10] sm:$0xff]  ;;  %v260_v23 = vmul.f32 2.0, %v25_v16  ;;  %v28_v25 = vld [vmem:[#allocation3 + $0x18] sm:$0xff]  ;;  %v29_v26 = vld [vmem:[#allocation3 + $0x20] sm:$0xff]  ;;  %v262_v28 = vmul.f32 2.0, %v26_v17  ;;  %s229_s0 = smov [#allocation6]  }
  0x14   :  { %v35_v1 = vshrl.u32 %v34_v0, 7  ;;  %v39_v2 = vand.u32 127, %v34_v0  ;;  %v58_v3 = vstv %s57_s23  ;;  %v264_v30 = vmul.f32 2.0, %v27_v18  ;;  %v30_v36 = vld [vmem:[#allocation3 + $0x28] sm:$0xff]  ;;  %s169_s1 = sshll.u32 %s229_s0, 4  ;;  %s170_s1 = int_to_ptr.vmem [resolvable:$true] %s169_s1 }
  0x15   :  { %v266_v34 = vmul.f32 2.0, %v28_v25  ;;  %v268_v39 = vmul.f32 2.0, %v29_v26  ;;  %v270_v48 = vmul.f32 2.0, %v30_v36  ;;  %s202_s24 = scalar_lea.vmem %s170_s1, 1024  ;;  %p207_p9 = scmp.lt.s32.totalorder %s170_s1, %s170_s1 }
  0x16   :  { %v47_v4 = vmul.u32 1024, %v35_v1  ;;  %v40_v5 = vadd.s32 128, %v39_v2  ;;  %v41_v6 = vadd.s32 256, %v39_v2  ;;  %v42_v7 = vadd.s32 384, %v39_v2  ;;  %p203_p8 = scmp.ne.s32.totalorder %s170_s1, %s202_s24  ;;  %p208_p10 = scmp.lt.s32.totalorder %s202_s24, %s202_s24 }
  0x17   :  { %v43_v8 = vadd.s32 512, %v39_v2  ;;  %v44_v9 = vadd.s32 640, %v39_v2  ;;  %v45_v10 = vadd.s32 768, %v39_v2  ;;  %v46_v11 = vadd.s32 896, %v39_v2 }
  0x18   :  { %v48_v12 = vadd.s32 %v47_v4, %v39_v2  ;;  %v49_v13 = vadd.s32 %v47_v4, %v40_v5  ;;  %v50_v14 = vadd.s32 %v47_v4, %v41_v6  ;;  %v51_v15 = vadd.s32 %v47_v4, %v42_v7  ;;  %v31_v5 = vld [vmem:[#allocation3 + $0x30] sm:$0xff]  ;;  %p209_p11 = por %p208_p10, %p207_p9 }
  0x19   :  { %v52_v19 = vadd.s32 %v47_v4, %v43_v8  ;;  %v53_v20 = vadd.s32 %v47_v4, %v44_v9  ;;  %v54_v21 = vadd.s32 %v47_v4, %v45_v10  ;;  %v55_v27 = vadd.s32 %v47_v4, %v46_v11 }
  0x1a   :  { %v59_v22 = vxor.u32 %v58_v3, %v48_v12  ;;  %v60_v24 = vxor.u32 %v58_v3, %v49_v13  ;;  %v61_v29 = vxor.u32 %v58_v3, %v50_v14  ;;  %v62_v31 = vxor.u32 %v58_v3, %v51_v15  ;;  %p210_p12 = pnand %p209_p11, %p203_p8 }
  0x1b   :  { %v63_v35 = vxor.u32 %v58_v3, %v52_v19  ;;  %v64_v40 = vxor.u32 %v58_v3, %v53_v20  ;;  %v65_v44 = vxor.u32 %v58_v3, %v54_v21  ;;  %v66_v56 = vxor.u32 %v58_v3, %v55_v27 }
  0x1c   :  { %v67_v32 = vshrl.u32 %v59_v22, 16  ;;  %v68_v33 = vshrl.u32 %v60_v24, 16  ;;  %v69_v37 = vshrl.u32 %v61_v29, 16  ;;  %v70_v38 = vshrl.u32 %v62_v31, 16 }
  0x1d   :  { %v71_v43 = vshrl.u32 %v63_v35, 16  ;;  %v72_v47 = vshrl.u32 %v64_v40, 16  ;;  %v73_v52 = vshrl.u32 %v65_v44, 16  ;;  %v74_v0 = vshrl.u32 %v66_v56, 16 }
  0x1e   :  { %v75_v41 = vxor.u32 %v67_v32, %v59_v22  ;;  %v76_v42 = vxor.u32 %v68_v33, %v60_v24  ;;  %v77_v45 = vxor.u32 %v69_v37, %v61_v29  ;;  %v78_v46 = vxor.u32 %v70_v38, %v62_v31 }
  0x1f   :  { %v79_v51 = vxor.u32 %v71_v43, %v63_v35  ;;  %v80_v55 = vxor.u32 %v72_v47, %v64_v40  ;;  %v81_v60 = vxor.u32 %v73_v52, %v65_v44  ;;  %v82_v10 = vxor.u32 %v74_v0, %v66_v56 }
  0x20   :  { %v83_v49 = vmul.u32 2146121005, %v75_v41  ;;  %v84_v50 = vmul.u32 2146121005, %v76_v42  ;;  %v145_v17 = vmul.f32 2.0, %v31_v5 }
  0x21   :  { %v85_v53 = vmul.u32 2146121005, %v77_v45  ;;  %v86_v54 = vmul.u32 2146121005, %v78_v46 }
  0x22   :  { %v91_v57 = vshrl.u32 %v83_v49, 15  ;;  %v92_v58 = vshrl.u32 %v84_v50, 15  ;;  %v87_v59 = vmul.u32 2146121005, %v79_v51  ;;  %v88_v63 = vmul.u32 2146121005, %v80_v55 }
  0x23   :  { %v93_v61 = vshrl.u32 %v85_v53, 15  ;;  %v94_v62 = vshrl.u32 %v86_v54, 15  ;;  %v89_v6 = vmul.u32 2146121005, %v81_v60  ;;  %v90_v26 = vmul.u32 2146121005, %v82_v10 }
  0x24   :  { %v99_v1 = vxor.u32 %v91_v57, %v83_v49  ;;  %v100_v2 = vxor.u32 %v92_v58, %v84_v50  ;;  %v95_v4 = vshrl.u32 %v87_v59, 15  ;;  %v96_v9 = vshrl.u32 %v88_v63, 15 }
  0x25   :  { %v101_v7 = vxor.u32 %v93_v61, %v85_v53  ;;  %v102_v8 = vxor.u32 %v94_v62, %v86_v54  ;;  %v97_v13 = vshrl.u32 %v89_v6, 15  ;;  %v98_v37 = vshrl.u32 %v90_v26, 15 }
  0x26   :  { %v107_v11 = vmul.u32 2221713035, %v99_v1  ;;  %v108_v12 = vmul.u32 2221713035, %v100_v2  ;;  %v103_v3 = vxor.u32 %v95_v4, %v87_v59  ;;  %v104_v16 = vxor.u32 %v96_v9, %v88_v63 }
  0x27   :  { %v109_v14 = vmul.u32 2221713035, %v101_v7  ;;  %v110_v15 = vmul.u32 2221713035, %v102_v8  ;;  %v105_v21 = vxor.u32 %v97_v13, %v89_v6  ;;  %v106_v49 = vxor.u32 %v98_v37, %v90_v26 }
  0x28   :  { %v115_v18 = vshrl.u32 %v107_v11, 16  ;;  %v116_v19 = vshrl.u32 %v108_v12, 16  ;;  %v111_v20 = vmul.u32 2221713035, %v103_v3  ;;  %v112_v25 = vmul.u32 2221713035, %v104_v16 }
  0x29   :  { %v117_v22 = vshrl.u32 %v109_v14, 16  ;;  %v118_v24 = vshrl.u32 %v110_v15, 16  ;;  %v113_v32 = vmul.u32 2221713035, %v105_v21  ;;  %v114_v50 = vmul.u32 2221713035, %v106_v49 }
  0x2a   :  { %v123_v27 = vxor.u32 %v115_v18, %v107_v11  ;;  %v124_v29 = vxor.u32 %v116_v19, %v108_v12  ;;  %v119_v31 = vshrl.u32 %v111_v20, 16  ;;  %v120_v36 = vshrl.u32 %v112_v25, 16 }
  0x2b   :  { %v125_v33 = vxor.u32 %v117_v22, %v109_v14  ;;  %v126_v35 = vxor.u32 %v118_v24, %v110_v15  ;;  %v121_v40 = vshrl.u32 %v113_v32, 16 }
  0x2c   :  { %vm131_vm0 = vcmp.ge.s32.totalorder %v123_v27, 0  ;;  %vm132_vm1 = vcmp.ge.s32.totalorder %v124_v29, 0  ;;  %v127_v38 = vxor.u32 %v119_v31, %v111_v20  ;;  %v128_v45 = vxor.u32 %v120_v36, %v112_v25 }
  0x2d   :  { %v147_v41 = vsel %vm131_vm0, %v260_v23, 0.0  ;;  %v148_v42 = vsel %vm132_vm1, %v262_v28, 0.0  ;;  %vm133_vm2 = vcmp.ge.s32.totalorder %v125_v33, 0  ;;  %vm134_vm3 = vcmp.ge.s32.totalorder %v126_v35, 0  ;;  %v32_v28 = vld [vmem:[#allocation3 + $0x38] sm:$0xff] }
  0x2e   :  { %155 = vst [vmem:[#allocation6] sm:$0xff] %v147_v41  ;;  %156 = vst [vmem:[#allocation6 + $0x8] sm:$0xff] %v148_v42  ;;  %v149_v43 = vsel %vm133_vm2, %v264_v30, 0.0  ;;  %v150_v44 = vsel %vm134_vm3, %v266_v34, 0.0  ;;  %vm135_vm4 = vcmp.ge.s32.totalorder %v127_v38, 0  ;;  %v129_v47 = vxor.u32 %v121_v40, %v113_v32 }
  0x2f   :  { %157 = vst [vmem:[#allocation6 + $0x10] sm:$0xff] %v149_v43  ;;  %158 = vst [vmem:[#allocation6 + $0x18] sm:$0xff] %v150_v44  ;;  %v151_v46 = vsel %vm135_vm4, %v268_v39, 0.0  ;;  %vm136_vm5 = vcmp.ge.s32.totalorder %v128_v45, 0  ;;  %v122_v30 = vshrl.u32 %v114_v50, 16  ;;  %v146_v34 = vmul.f32 2.0, %v32_v28 }
  0x30   :  { %159 = vst [vmem:[#allocation6 + $0x20] sm:$0xff] %v151_v46  ;;  %v152_v23 = vsel %vm136_vm5, %v270_v48, 0.0  ;;  %vm137_vm6 = vcmp.ge.s32.totalorder %v129_v47, 0 }
  0x31   :  { %160 = vst [vmem:[#allocation6 + $0x28] sm:$0xff] %v152_v23  ;;  %v153_v51 = vsel %vm137_vm6, %v145_v17, 0.0  ;;  %v130_v52 = vxor.u32 %v122_v30, %v114_v50 }
  0x32   :  { %161 = vst [vmem:[#allocation6 + $0x30] sm:$0xff] %v153_v51 }
  0x33   :  { %vm138_vm7 = vcmp.ge.s32.totalorder %v130_v52, 0 }
  0x34   :  { %v154_v39 = vsel %vm138_vm7, %v146_v34, 0.0 }
  0x35   :  { %162 = vst [vmem:[#allocation6 + $0x38] sm:$0xff] %v154_v39 }
  0x36   :  { %213 = shalt.err (!%p210_p12)
}
  0x37   :  { %s214_s27 = scalar_lea.hbm %s292_s2, 1024 }
  0x38   :  { %p215_p13 = scmp.ne.s32.totalorder %s292_s2, %s214_s27  ;;  %p218_p0 = scmp.lt.u32.totalorder %s214_s27, %s292_s2 }
  0x3a   :  { %p220_p1 = pnand %p218_p0, %p215_p13 }
  0x3c   :  { %223 = shalt.err (!%p220_p1)
}
  0x3d   :  { %172 = dma.vmem_to_hbm [thread:$0]  %s170_s1, 1024, %s292_s2, [#allocation5]  }
  0x3e   :  { %226 = dma.done.wait [#allocation5], 1024  }
  0x3f   :  { %227 = vsyncadd [#allocation5], 4294966272 }
  0x40   :  { %176 = vsyncpa [#allocation4], 1 }
  0x41   :  { %177 = vsyncpa [#allocation5], 1 }

</bundles_post_ra>
